<compile_context>
chip_gen: v7x
topology: tpu7x:2x2x1
jax: 0.10.0
libtpu: 0.0.40
codegen_flags: <defaults>
</compile_context>

<pallas_src>
import jax
import jax.numpy as jnp
from jax.experimental import pallas as pl
from jax.experimental.pallas import tpu as pltpu


# ----------------------------------------------------------------------------- kernels
def _outconv_kernel_vpu(x_ref, w_ref, b_ref, o_ref):
    """Tiny-channel path: unrolled VPU multiply-add, exact f32 accumulation.

    x_ref: (BN, C_in, T)   pixel tile, pixels on lanes
    w_ref: (C_out, C_in)   resident in VMEM
    b_ref: (C_out, 1)      resident in VMEM
    o_ref: (BN, C_out, T)  lane-dense output tile
    """
    bn, c_in, _ = x_ref.shape
    w = w_ref[...]          # (C_out, C_in) — tiny, lives in vregs
    bias = b_ref[...]       # (C_out, 1)
    for b in range(bn):                         # static unroll (bn is small)
        acc = None
        for ci in range(c_in):                  # static unroll over tiny C_in
            # (C_out, 1) * (1, T) -> (C_out, T); lane + sublane broadcasts, VPU mul/add.
            term = w[:, ci:ci + 1] * x_ref[b, ci:ci + 1, :]
            acc = term if acc is None else acc + term
        # Single dense (C_out, T) store per batch row keeps the vst slot unmasked-friendly.
        o_ref[b] = (acc + bias).astype(o_ref.dtype)


def _outconv_kernel_mxu(x_ref, w_ref, b_ref, o_ref):
    """General path: MXU contraction (used when c_in or c_out > 8).

    Note: f32 MXU matmuls on TPU may use reduced-precision passes at default matmul
    precision; for bit-accurate f32 pass precision=jax.lax.Precision.HIGHEST here.
    """
    bn = x_ref.shape[0]
    w = w_ref[...]
    bias = b_ref[...]
    for b in range(bn):                         # static unroll (bn is small)
        acc = jnp.dot(w, x_ref[b], preferred_element_type=jnp.float32)   # (C_out, T)
        o_ref[b] = (acc + bias).astype(o_ref.dtype)


# ----------------------------------------------------------------------------- wrapper
def _vmem_capacity_bytes():
    """Physical VMEM per TensorCore; conservative v7x (64 MiB) fallback if query fails."""
    try:
        info = pltpu.get_tpu_info()
        cap = int(getattr(info, "vmem_capacity_bytes", 0) or 0)
        if cap > 0:
            return cap
    except Exception:
        pass
    return 64 * 1024 * 1024


def out_conv(x_nchw, weight, bias):
    """1x1 Conv2d forward (PyTorch OutConv semantics).

    x_nchw: (N, C_in, H, W) float32
    weight: (C_out, C_in, 1, 1) float32  (PyTorch conv weight layout)
    bias:   (C_out,) float32
    returns (N, C_out, H, W) float32
    """
    n, c_in, h, w_sp = x_nchw.shape
    c_out = weight.shape[0]
    hw = h * w_sp

    # Free reshapes only — no transposes.
    x = x_nchw.reshape(n, c_in, hw)          # (N, C_in, HW)
    w_mat = weight.reshape(c_out, c_in)      # (C_out, C_in)
    b_col = bias.reshape(c_out, 1)           # (C_out, 1)

    # Lane-dense pixel axis: pad HW up to a multiple of 128 if needed so every output
    # store is an unmasked, lane-dense vst (free when HW is already a 128-multiple).
    hw_p = ((hw + 127) // 128) * 128
    if hw_p != hw:
        x = jnp.pad(x, ((0, 0), (0, 0), (0, hw_p - hw)))

    # ---- generation-aware tile sizing, derived from VMEM and channel counts ----
    itemsize = 4                                     # f32
    vmem_cap = _vmem_capacity_bytes()                # 128 MiB v5e/v6e, 64 MiB v7x
    bpp = 2 * itemsize * (c_in + c_out)              # double-buffered in+out bytes / pixel
    ws_budget = max(int(0.45 * vmem_cap), 1 << 20)   # ~57 MiB v5e/v6e, ~28 MiB v7x
    t_max = max((ws_budget // bpp) // 128 * 128, 128)

    folded_bytes = n * hw_p * bpp
    if hw_p <= t_max and folded_bytes <= min(ws_budget, 4 << 20):
        # Tiny problem: fold the batch into a single grid step — the ~0.35 us/step
        # overhead would otherwise dominate at these sizes.
        bn, t = n, hw_p
    else:
        bn = 1
        t = min(t_max, hw_p)
        if n == 1 and t >= hw_p and hw_p > 128:
            # A lone large image that fits one tile: split into >=2 pixel tiles so
            # multi-TensorCore parts (v7x megacore) still get parallel grid steps.
            t = max(((-(-hw_p // 2)) + 127) // 128 * 128, 128)

    n_ptiles = pl.cdiv(hw_p, t)
    grid = (n // bn, n_ptiles)

    # Tiny channel counts -> exact-f32 VPU path (also avoids the padded f32 MXU path
    # that can bind on v5e); wider channels -> MXU.
    kernel = _outconv_kernel_vpu if (c_in <= 8 and c_out <= 8) else _outconv_kernel_mxu

    flops = 2 * n * hw * c_in * c_out
    bytes_accessed = itemsize * (n * hw_p * (c_in + c_out) + c_out * c_in + c_out)
    vmem_limit = min(int(0.75 * vmem_cap), 96 * 1024 * 1024)   # 96 MiB v5e/v6e, 48 MiB v7x

    out = pl.pallas_call(
        kernel,
        out_shape=jax.ShapeDtypeStruct((n, c_out, hw_p), x_nchw.dtype),
        grid_spec=pltpu.PrefetchScalarGridSpec(
            num_scalar_prefetch=0,
            grid=grid,
            in_specs=[
                pl.BlockSpec((bn, c_in, t), lambda b, p: (b, 0, p)),   # activations
                pl.BlockSpec((c_out, c_in), lambda b, p: (0, 0)),      # weight (resident)
                pl.BlockSpec((c_out, 1), lambda b, p: (0, 0)),         # bias   (resident)
            ],
            out_specs=pl.BlockSpec((bn, c_out, t), lambda b, p: (b, 0, p)),
        ),
        compiler_params=pltpu.CompilerParams(
            dimension_semantics=("parallel", "parallel"),
            vmem_limit_bytes=vmem_limit,
        ),
        cost_estimate=pl.CostEstimate(
            flops=flops, transcendentals=0, bytes_accessed=bytes_accessed),
    )(x, w_mat, b_col)

    if hw_p != hw:
        out = out[:, :, :hw]
    return out.reshape(n, c_out, h, w_sp)   # free reshape back to NCHW


# -------------------------------------------------------------------------------- demo
if __name__ == "__main__":
    key = jax.random.PRNGKey(0)
    k_x, k_w, k_b, k_x2, k_w2, k_b2 = jax.random.split(key, 6)

    # Primary config (matches the module's role as a small final 1x1 conv): VPU path.
    N, C_IN, C_OUT, H, W = 2, 4, 3, 16, 16
    x = jax.random.normal(k_x, (N, C_IN, H, W), dtype=jnp.float32)
    bound = 1.0 / jnp.sqrt(C_IN * 1 * 1)   # mimics PyTorch Conv2d init bound 1/sqrt(fan_in)
    weight = jax.random.uniform(k_w, (C_OUT, C_IN, 1, 1), minval=-bound, maxval=bound,
                                dtype=jnp.float32)
    bias = jax.random.uniform(k_b, (C_OUT,), minval=-bound, maxval=bound, dtype=jnp.float32)

    y = out_conv(x, weight, bias)
    jax.block_until_ready(y)

    ref = jnp.einsum("nchw,oc->nohw", x, weight.reshape(C_OUT, C_IN),
                     precision=jax.lax.Precision.HIGHEST) + bias[None, :, None, None]
    assert y.shape == (N, C_OUT, H, W)
    assert jnp.allclose(y, ref, atol=1e-5, rtol=1e-5)   # VPU path is exact f32

    # Secondary config: wider channels (MXU path) + non-128-multiple H*W (pad path).
    N2, C_IN2, C_OUT2, H2, W2 = 1, 32, 4, 10, 10        # hw=100 -> padded to 128
    x2 = jax.random.normal(k_x2, (N2, C_IN2, H2, W2), dtype=jnp.float32)
    bound2 = 1.0 / jnp.sqrt(C_IN2)
    weight2 = jax.random.uniform(k_w2, (C_OUT2, C_IN2, 1, 1), minval=-bound2, maxval=bound2,
                                 dtype=jnp.float32)
    bias2 = jax.random.uniform(k_b2, (C_OUT2,), minval=-bound2, maxval=bound2,
                               dtype=jnp.float32)

    y2 = out_conv(x2, weight2, bias2)
    jax.block_until_ready(y2)

    ref2 = jnp.einsum("nchw,oc->nohw", x2, weight2.reshape(C_OUT2, C_IN2),
                      precision=jax.lax.Precision.HIGHEST) + bias2[None, :, None, None]
    assert y2.shape == (N2, C_OUT2, H2, W2)
    # Loose tolerance: MXU f32 matmuls may use reduced-precision passes at default
    # matmul precision (pass precision=HIGHEST in _outconv_kernel_mxu if bit-accuracy
    # is required).
    assert jnp.allclose(y2, ref2, atol=2e-2, rtol=2e-2)

    print("KERNEL_OK")
</pallas_src>

<mosaic_0001>
module attributes {stable_mosaic.version = 11 : i64} {
  func.func @_outconv_kernel_vpu(%arg0: i32, %arg1: i32, %arg2: memref<2x4x256xf32, #tpu.memory_space<vmem>>, %arg3: memref<3x4xf32, #tpu.memory_space<vmem>>, %arg4: memref<3x1xf32, #tpu.memory_space<vmem>>, %arg5: memref<2x3x256xf32, #tpu.memory_space<vmem>>) attributes {dimension_semantics = [#tpu.dimension_semantics<parallel>, #tpu.dimension_semantics<parallel>], iteration_bounds = array<i64: 1, 1>, scalar_prefetch = 0 : i64, scratch_operands = 0 : i64, tpu.core_type = #tpu.core_type<tc>, window_params = [{transform_indices = @transform_0, window_bounds = array<i64: 2, 4, 256>}, {pipeline_mode = #tpu.pipeline_mode<synchronous>, transform_indices = @transform_1, window_bounds = array<i64: 3, 4>}, {pipeline_mode = #tpu.pipeline_mode<synchronous>, transform_indices = @transform_2, window_bounds = array<i64: 3, 1>}, {transform_indices = @transform_3, window_bounds = array<i64: 2, 3, 256>}]} {
    %c0 = arith.constant 0 : index
    %c0_0 = arith.constant 0 : index
    %0 = vector.load %arg3[%c0, %c0_0] : memref<3x4xf32, #tpu.memory_space<vmem>>, vector<3x4xf32>
    %c0_1 = arith.constant 0 : index
    %c0_2 = arith.constant 0 : index
    %1 = vector.load %arg4[%c0_1, %c0_2] : memref<3x1xf32, #tpu.memory_space<vmem>>, vector<3x1xf32>
    %2 = vector.extract_strided_slice %0 {offsets = [0, 0], sizes = [3, 1], strides = [1, 1]} : vector<3x4xf32> to vector<3x1xf32>
    %c0_3 = arith.constant 0 : index
    %c0_4 = arith.constant 0 : index
    %c0_5 = arith.constant 0 : index
    %3 = vector.load %arg2[%c0_3, %c0_4, %c0_5] : memref<2x4x256xf32, #tpu.memory_space<vmem>>, vector<1x1x256xf32>
    %4 = vector.shape_cast %3 : vector<1x1x256xf32> to vector<1x256xf32>
    %5 = vector.broadcast %2 : vector<3x1xf32> to vector<3x256xf32>
    %6 = vector.broadcast %4 : vector<1x256xf32> to vector<3x256xf32>
    %7 = arith.mulf %5, %6 : vector<3x256xf32>
    %8 = vector.extract_strided_slice %0 {offsets = [0, 1], sizes = [3, 1], strides = [1, 1]} : vector<3x4xf32> to vector<3x1xf32>
    %c0_6 = arith.constant 0 : index
    %c1 = arith.constant 1 : index
    %c0_7 = arith.constant 0 : index
    %9 = vector.load %arg2[%c0_6, %c1, %c0_7] : memref<2x4x256xf32, #tpu.memory_space<vmem>>, vector<1x1x256xf32>
    %10 = vector.shape_cast %9 : vector<1x1x256xf32> to vector<1x256xf32>
    %11 = vector.broadcast %8 : vector<3x1xf32> to vector<3x256xf32>
    %12 = vector.broadcast %10 : vector<1x256xf32> to vector<3x256xf32>
    %13 = arith.mulf %11, %12 : vector<3x256xf32>
    %14 = arith.addf %7, %13 : vector<3x256xf32>
    %15 = vector.extract_strided_slice %0 {offsets = [0, 2], sizes = [3, 1], strides = [1, 1]} : vector<3x4xf32> to vector<3x1xf32>
    %c0_8 = arith.constant 0 : index
    %c2 = arith.constant 2 : index
    %c0_9 = arith.constant 0 : index
    %16 = vector.load %arg2[%c0_8, %c2, %c0_9] : memref<2x4x256xf32, #tpu.memory_space<vmem>>, vector<1x1x256xf32>
    %17 = vector.shape_cast %16 : vector<1x1x256xf32> to vector<1x256xf32>
    %18 = vector.broadcast %15 : vector<3x1xf32> to vector<3x256xf32>
    %19 = vector.broadcast %17 : vector<1x256xf32> to vector<3x256xf32>
    %20 = arith.mulf %18, %19 : vector<3x256xf32>
    %21 = arith.addf %14, %20 : vector<3x256xf32>
    %22 = vector.extract_strided_slice %0 {offsets = [0, 3], sizes = [3, 1], strides = [1, 1]} : vector<3x4xf32> to vector<3x1xf32>
    %c0_10 = arith.constant 0 : index
    %c3 = arith.constant 3 : index
    %c0_11 = arith.constant 0 : index
    %23 = vector.load %arg2[%c0_10, %c3, %c0_11] : memref<2x4x256xf32, #tpu.memory_space<vmem>>, vector<1x1x256xf32>
    %24 = vector.shape_cast %23 : vector<1x1x256xf32> to vector<1x256xf32>
    %25 = vector.broadcast %22 : vector<3x1xf32> to vector<3x256xf32>
    %26 = vector.broadcast %24 : vector<1x256xf32> to vector<3x256xf32>
    %27 = arith.mulf %25, %26 : vector<3x256xf32>
    %28 = arith.addf %21, %27 : vector<3x256xf32>
    %29 = vector.broadcast %1 : vector<3x1xf32> to vector<3x256xf32>
    %30 = arith.addf %28, %29 : vector<3x256xf32>
    %c0_12 = arith.constant 0 : index
    %c0_13 = arith.constant 0 : index
    %c0_14 = arith.constant 0 : index
    %31 = vector.load %arg5[%c0_12, %c0_13, %c0_14] : memref<2x3x256xf32, #tpu.memory_space<vmem>>, vector<1x3x256xf32>
    %32 = vector.shape_cast %31 : vector<1x3x256xf32> to vector<3x256xf32>
    %33 = vector.shape_cast %30 : vector<3x256xf32> to vector<1x3x256xf32>
    tpu.vector_store %arg5[%c0_12, %c0_13, %c0_14], %33 {strides = array<i32>} : memref<2x3x256xf32, #tpu.memory_space<vmem>>, vector<1x3x256xf32>,
    %34 = vector.extract_strided_slice %0 {offsets = [0, 0], sizes = [3, 1], strides = [1, 1]} : vector<3x4xf32> to vector<3x1xf32>
    %c1_15 = arith.constant 1 : index
    %c0_16 = arith.constant 0 : index
    %c0_17 = arith.constant 0 : index
    %35 = vector.load %arg2[%c1_15, %c0_16, %c0_17] : memref<2x4x256xf32, #tpu.memory_space<vmem>>, vector<1x1x256xf32>
    %36 = vector.shape_cast %35 : vector<1x1x256xf32> to vector<1x256xf32>
    %37 = vector.broadcast %34 : vector<3x1xf32> to vector<3x256xf32>
    %38 = vector.broadcast %36 : vector<1x256xf32> to vector<3x256xf32>
    %39 = arith.mulf %37, %38 : vector<3x256xf32>
    %40 = vector.extract_strided_slice %0 {offsets = [0, 1], sizes = [3, 1], strides = [1, 1]} : vector<3x4xf32> to vector<3x1xf32>
    %c1_18 = arith.constant 1 : index
    %c1_19 = arith.constant 1 : index
    %c0_20 = arith.constant 0 : index
    %41 = vector.load %arg2[%c1_18, %c1_19, %c0_20] : memref<2x4x256xf32, #tpu.memory_space<vmem>>, vector<1x1x256xf32>
    %42 = vector.shape_cast %41 : vector<1x1x256xf32> to vector<1x256xf32>
    %43 = vector.broadcast %40 : vector<3x1xf32> to vector<3x256xf32>
    %44 = vector.broadcast %42 : vector<1x256xf32> to vector<3x256xf32>
    %45 = arith.mulf %43, %44 : vector<3x256xf32>
    %46 = arith.addf %39, %45 : vector<3x256xf32>
    %47 = vector.extract_strided_slice %0 {offsets = [0, 2], sizes = [3, 1], strides = [1, 1]} : vector<3x4xf32> to vector<3x1xf32>
    %c1_21 = arith.constant 1 : index
    %c2_22 = arith.constant 2 : index
    %c0_23 = arith.constant 0 : index
    %48 = vector.load %arg2[%c1_21, %c2_22, %c0_23] : memref<2x4x256xf32, #tpu.memory_space<vmem>>, vector<1x1x256xf32>
    %49 = vector.shape_cast %48 : vector<1x1x256xf32> to vector<1x256xf32>
    %50 = vector.broadcast %47 : vector<3x1xf32> to vector<3x256xf32>
    %51 = vector.broadcast %49 : vector<1x256xf32> to vector<3x256xf32>
    %52 = arith.mulf %50, %51 : vector<3x256xf32>
    %53 = arith.addf %46, %52 : vector<3x256xf32>
    %54 = vector.extract_strided_slice %0 {offsets = [0, 3], sizes = [3, 1], strides = [1, 1]} : vector<3x4xf32> to vector<3x1xf32>
    %c1_24 = arith.constant 1 : index
    %c3_25 = arith.constant 3 : index
    %c0_26 = arith.constant 0 : index
    %55 = vector.load %arg2[%c1_24, %c3_25, %c0_26] : memref<2x4x256xf32, #tpu.memory_space<vmem>>, vector<1x1x256xf32>
    %56 = vector.shape_cast %55 : vector<1x1x256xf32> to vector<1x256xf32>
    %57 = vector.broadcast %54 : vector<3x1xf32> to vector<3x256xf32>
    %58 = vector.broadcast %56 : vector<1x256xf32> to vector<3x256xf32>
    %59 = arith.mulf %57, %58 : vector<3x256xf32>
    %60 = arith.addf %53, %59 : vector<3x256xf32>
    %61 = vector.broadcast %1 : vector<3x1xf32> to vector<3x256xf32>
    %62 = arith.addf %60, %61 : vector<3x256xf32>
    %c1_27 = arith.constant 1 : index
    %c0_28 = arith.constant 0 : index
    %c0_29 = arith.constant 0 : index
    %63 = vector.load %arg5[%c1_27, %c0_28, %c0_29] : memref<2x3x256xf32, #tpu.memory_space<vmem>>, vector<1x3x256xf32>
    %64 = vector.shape_cast %63 : vector<1x3x256xf32> to vector<3x256xf32>
    %65 = vector.shape_cast %62 : vector<3x256xf32> to vector<1x3x256xf32>
    tpu.vector_store %arg5[%c1_27, %c0_28, %c0_29], %65 {strides = array<i32>} : memref<2x3x256xf32, #tpu.memory_space<vmem>>, vector<1x3x256xf32>,
    return
  }
  func.func @transform_0(%arg0: i32, %arg1: i32) -> (i32, i32, i32) {
    %c0_i32 = arith.constant 0 : i32
    %c0_i32_0 = arith.constant 0 : i32
    return %arg0, %c0_i32, %arg1 : i32, i32, i32
  }
  func.func @transform_1(%arg0: i32, %arg1: i32) -> (i32, i32) {
    %c0_i32 = arith.constant 0 : i32
    %c0_i32_0 = arith.constant 0 : i32
    %c0_i32_1 = arith.constant 0 : i32
    return %c0_i32, %c0_i32_0 : i32, i32
  }
  func.func @transform_2(%arg0: i32, %arg1: i32) -> (i32, i32) {
    %c0_i32 = arith.constant 0 : i32
    %c0_i32_0 = arith.constant 0 : i32
    %c0_i32_1 = arith.constant 0 : i32
    return %c0_i32, %c0_i32_0 : i32, i32
  }
  func.func @transform_3(%arg0: i32, %arg1: i32) -> (i32, i32, i32) {
    %c0_i32 = arith.constant 0 : i32
    %c0_i32_0 = arith.constant 0 : i32
    return %arg0, %c0_i32, %arg1 : i32, i32, i32
  }
}

</mosaic_0001>

<bundles_post_ra>
// kernel: tpu_custom_call.1
= control target key start
LH: loop header
LB: loop body
LE: loop exit
PB: predicated region body
PF: predicated region fallthrough
CT: control target
= control target key end

     0   :  { %8 = vsyncpa [#allocation3], 0  ;;  %s244_s12 = smov [#allocation2]   ;;  %s295_s0 = inlined_call_operand.hbm [shape: f32[2,4,256], index: 0, kind: input, shape index: {}]   ;;  %s296_s1 = inlined_call_operand.vmem [shape: f32[3,4], index: 1, kind: input, shape index: {}]   ;;  %s297_s2 = inlined_call_operand.vmem [shape: f32[3,1], index: 2, kind: input, shape index: {}]   ;;  %s298_s3 = inlined_call_operand.vmem [shape: f32[2,3,256], index: 3, kind: output, shape index: {}]  }
   0x1   :  { %s14_s13 = sshll.u32 %s244_s12, 4  ;;  %s220_s16 = scalar_lea.hbm %s295_s0, 256  ;;  %s15_s13 = int_to_ptr.vmem [resolvable:$true] %s14_s13 }
   0x2   :  { %p221_p0 = scmp.ne.s32.totalorder %s295_s0, %s220_s16  ;;  %p224_p1 = scmp.lt.u32.totalorder %s220_s16, %s295_s0 }
   0x4   :  { %p226_p2 = pnand %p224_p1, %p221_p0 }
   0x6   :  { %229 = shalt.err (!%p226_p2)
}
   0x7   :  { %s230_s21 = scalar_lea.vmem %s15_s13, 256  ;;  %p235_p4 = scmp.lt.s32.totalorder %s15_s13, %s15_s13 }
   0x8   :  { %p231_p3 = scmp.ne.s32.totalorder %s15_s13, %s230_s21  ;;  %p236_p5 = scmp.lt.s32.totalorder %s230_s21, %s230_s21 }
   0xa   :  { %p237_p6 = por %p236_p5, %p235_p4 }
   0xc   :  { %p238_p7 = pnand %p237_p6, %p231_p3 }
   0xe   :  { %241 = shalt.err (!%p238_p7)
}
   0xf   :  { %s245_s22 = smov 128   ;;  %s246_s23 = smov 8  }
  0x10   :  { %20 = dma.hbm_to_vmem [thread:$0]  %s295_s0, 256, %s15_s13, [#allocation3], %s245_s22, %s245_s22, %s246_s23  }
  0x11   :  { %242 = dma.done.wait [#allocation3], 256  }
  0x12   :  { %243 = vsyncadd [#allocation3], 4294967040  ;;  %v247_v0 = vmov 0   ;;  %v248_v1 = vmov 2   ;;  %v28_v2 = vld [vmem:[%s296_s1] sm:$0x7]  ;;  %v37_v6 = vlaneseq }
  0x13   :  { %214 = vset.pattern.permute.xlu0 %v247_v0  ;;  %216 = vset.pattern.permute.xlu1 %v248_v1  ;;  %v249_v3 = vmov 1   ;;  %v250_v4 = vmov 3   ;;  %v29_v5 = vld [vmem:[%s297_s2] sm:$0x7] }
  0x14   :  { %33 = vperm.xlu0 %214, %v28_v2   ;;  %73 = vperm.xlu1 %216, %v28_v2   ;;  %v38_v7 = vshrl.u32 %v37_v6, 7  ;;  %v30_v10 = vld [vmem:[#allocation2] ss:$4 sm:$0x3] }
  0x15   :  { %v125_v11 = vld [vmem:[#allocation2 + $0x8] ss:$4 sm:$0x3]  ;;  %v71_v12 = vld [vmem:[#allocation2 + $0x2] ss:$4 sm:$0x3] }
  0x16   :  { %v39_v8 = vsub.s32 0, %v38_v7  ;;  %v43_v9 = vsub.s32 1, %v38_v7  ;;  %v157_v13 = vld [vmem:[#allocation2 + $0xa] ss:$4 sm:$0x3] }
  0x17   :  { %v50_v14 = vld [vmem:[#allocation2 + $0x1] ss:$4 sm:$0x3]  ;;  %v140_v15 = vld [vmem:[#allocation2 + $0x9] ss:$4 sm:$0x3] }
  0x18   :  { %215 = vset.pattern.permute.xlu0 %v249_v3  ;;  %217 = vset.pattern.permute.xlu1 %v250_v4  ;;  %v40_v16 = vrot.slane %v30_v10, %v39_v8  ;;  %v44_v17 = vrot.slane %v30_v10, %v43_v9  ;;  %v130_v18 = vrot.slane %v125_v11, %v39_v8  ;;  %v92_v22 = vld [vmem:[#allocation2 + $0x3] ss:$4 sm:$0x3]  ;;  %v174_v23 = vld [vmem:[#allocation2 + $0xb] ss:$4 sm:$0x3] }
  0x19   :  { %52 = vperm.xlu0 %215, %v28_v2   ;;  %94 = vperm.xlu1 %217, %v28_v2   ;;  %v134_v19 = vrot.slane %v125_v11, %v43_v9  ;;  %v80_v24 = vrot.slane %v71_v12, %v39_v8  ;;  %v84_v25 = vrot.slane %v71_v12, %v43_v9 }
  0x1a   :  { %v162_v26 = vrot.slane %v157_v13, %v39_v8  ;;  %v166_v27 = vrot.slane %v157_v13, %v43_v9  ;;  %v59_v28 = vrot.slane %v50_v14, %v39_v8  ;;  %v63_v29 = vrot.slane %v50_v14, %v43_v9 }
  0x1b   :  { %v145_v30 = vrot.slane %v140_v15, %v39_v8  ;;  %v149_v31 = vrot.slane %v140_v15, %v43_v9  ;;  %v101_v32 = vrot.slane %v92_v22, %v39_v8  ;;  %v105_v33 = vrot.slane %v92_v22, %v43_v9 }
  0x1c   :  { %v179_v34 = vrot.slane %v174_v23, %v39_v8  ;;  %v183_v35 = vrot.slane %v174_v23, %v43_v9 }
  0x1d   :  { %218 = vset.pattern.permute.xlu1 %v247_v0  ;;  %219 = vset.pattern.permute.xlu0 %v247_v0 }
  0x1e   :  { %114 = vperm.xlu1 %218, %v29_v5  }
  0x93   :  { %v34_v20 = vpop.permute.xlu0 %33  ;;  %v74_v21 = vpop.permute.xlu1 %73 }
  0x94   :  { %v47_v36 = vmul.f32 %v40_v16, %v34_v20  ;;  %v48_v37 = vmul.f32 %v44_v17, %v34_v20  ;;  %v137_v38 = vmul.f32 %v130_v18, %v34_v20  ;;  %v138_v39 = vmul.f32 %v134_v19, %v34_v20 }
  0x95   :  { %v87_v40 = vmul.f32 %v80_v24, %v74_v21  ;;  %v88_v41 = vmul.f32 %v84_v25, %v74_v21  ;;  %v169_v42 = vmul.f32 %v162_v26, %v74_v21  ;;  %v170_v43 = vmul.f32 %v166_v27, %v74_v21 }
  0x98   :  { %v53_v44 = vpop.permute.xlu0 %52  ;;  %v95_v45 = vpop.permute.xlu1 %94 }
  0x99   :  { %v66_v46 = vmul.f32 %v59_v28, %v53_v44  ;;  %v67_v47 = vmul.f32 %v63_v29, %v53_v44  ;;  %v152_v48 = vmul.f32 %v145_v30, %v53_v44  ;;  %v153_v49 = vmul.f32 %v149_v31, %v53_v44 }
  0x9a   :  { %v108_v50 = vmul.f32 %v101_v32, %v95_v45  ;;  %v109_v51 = vmul.f32 %v105_v33, %v95_v45  ;;  %v186_v52 = vmul.f32 %v179_v34, %v95_v45  ;;  %v187_v53 = vmul.f32 %v183_v35, %v95_v45 }
  0x9b   :  { %v68_v54 = vadd.f32 %v66_v46, %v47_v36  ;;  %v69_v55 = vadd.f32 %v67_v47, %v48_v37  ;;  %v154_v56 = vadd.f32 %v152_v48, %v137_v38  ;;  %v155_v57 = vadd.f32 %v153_v49, %v138_v39 }
  0x9d   :  { %v89_v58 = vadd.f32 %v87_v40, %v68_v54  ;;  %v90_v59 = vadd.f32 %v88_v41, %v69_v55  ;;  %v171_v60 = vadd.f32 %v169_v42, %v154_v56  ;;  %v172_v61 = vadd.f32 %v170_v43, %v155_v57  ;;  %v115_v62 = vpop.permute.xlu1 %114 }
  0x9f   :  { %v110_v63 = vadd.f32 %v108_v50, %v89_v58  ;;  %v111_v0 = vadd.f32 %v109_v51, %v90_v59  ;;  %v188_v1 = vadd.f32 %v186_v52, %v171_v60  ;;  %v189_v2 = vadd.f32 %v187_v53, %v172_v61 }
  0xa1   :  { %v117_v3 = vadd.f32 %v115_v62, %v110_v63  ;;  %v118_v4 = vadd.f32 %v115_v62, %v111_v0  ;;  %v190_v5 = vadd.f32 %v188_v1, %v115_v62  ;;  %v191_v6 = vadd.f32 %v189_v2, %v115_v62 }
  0xa3   :  { %v121_v7 = vcombine.low %v117_v3, %v118_v4  ;;  %v194_v8 = vcombine.low %v190_v5, %v191_v6 }
  0xa5   :  { %123 = vst [vmem:[%s298_s3] sm:$0x77] %v121_v7  ;;  %206 = vst [vmem:[%s298_s3 + $0x8] sm:$0x77] %v194_v8 }
  0xa6   :  { %202 = vsyncpa [#allocation3], 1 }

</bundles_post_ra>
